<compile_context>
chip_gen: v6e
topology: v6e:2x2x1
jax: 0.10.0
libtpu: 0.0.40
codegen_flags: <defaults>
</compile_context>

<pallas_src>
import jax
import jax.numpy as jnp
from jax import lax
from jax.experimental import pallas as pl
from jax.experimental.pallas import tpu as pltpu


def entity_sbert_kernel(x_ref, len_ref, w_ref, b_ref, out_ref):
    # x_ref:   (TB, S, H_in) f32  token input embeddings for TB batch rows
    # len_ref: (TB, 1)       i32  number of valid (non-padded) tokens per row
    # w_ref:   (H_in, H)     bf16 stand-in encoder weight (grid-invariant)
    # b_ref:   (1, H)        f32  stand-in encoder bias   (grid-invariant)
    # out_ref: (TB, H)       f32  sentence embeddings (lane/sublane dense)
    x = x_ref[...]                                   # (TB, S, H_in) f32
    lens = len_ref[...]                              # (TB, 1) int32

    # Rebuild the token-validity mask in-register from per-row lengths:
    # no (B, S) mask DMA, no lane->sublane relayout, no XLU lane-reduce for
    # sum_mask.  Assumes right-padding (mask == [1]*len + [0]*(S-len)).
    pos = lax.broadcasted_iota(jnp.int32, x.shape, 1)          # seq position
    valid = pos < lens[:, :, None]                             # (TB, S, H_in)

    # Masked sum over the sequence axis (VPU select + sublane reduce).
    # NOTE(v7x): this elementwise path could run in bf16 (mask is {0,1}) with
    # an f32 accumulator to halve VALU work; kept f32 here for exactness.
    pooled = jnp.sum(jnp.where(valid, x, 0.0), axis=1)         # (TB, H_in)

    # sum_mask is just the length; clamp keeps fully padded rows finite
    # (the original torch code would hit 0/0 there).  Exact f32 divide —
    # the approx-reciprocal path caused the previous numeric mismatch.
    denom = jnp.maximum(lens.astype(jnp.float32), 1e-9)        # (TB, 1)
    mean_x = pooled / denom                                    # (TB, H_in)

    # Pool-then-project (valid ONLY for the linear stand-in encoder):
    # bf16 MXU operands, f32 accumulation, f32 bias add.
    out = jnp.dot(mean_x.astype(jnp.bfloat16), w_ref[...],
                  preferred_element_type=jnp.float32) + b_ref[...]
    out_ref[...] = out


def entity_sbert_forward(features, w, b, *, tb=16):
    """features: dict with
         'input_embeds'   (B, S, H_in) float32   (pre-encoder token inputs)
         'attention_mask' (B, S)       int       (right-padded 1s then 0s)
       Returns features updated with 'sentence_embedding' (B, H) float32."""
    x = features["input_embeds"]
    attention_mask = features["attention_mask"]
    B, S, H_in = x.shape
    H = w.shape[1]
    assert B % tb == 0, "batch must be divisible by the batch tile"
    # Keep at least 2 grid steps so the 'parallel' axis can split across both
    # v7x TensorCores (single-TC v5e/v6e don't care).
    assert (B // tb) >= 2, "choose tb so the grid has >= 2 steps"
    assert H_in % 128 == 0 and H % 128 == 0, "hidden dims must be 128-aligned"

    # Per-row valid-token counts; upstream tokenizers can supply these
    # directly.  This replaces streaming a (B, S) mask into every tile.
    lengths = jnp.sum(attention_mask.astype(jnp.int32), axis=1,
                      keepdims=True)                            # (B, 1) i32

    # One-time parameter prep (NOT a per-call pass over the big x array —
    # x itself is streamed to the kernel in f32, no wrapper cast).
    w_bf16 = w.astype(jnp.bfloat16)
    b2 = b.reshape(1, H).astype(jnp.float32)

    # Explicit scoped-VMEM budget derived from the live block bytes:
    # double-buffered x/len/out blocks + (double-buffered) resident w/b.
    # At real SBERT shapes (S=512, H_in=768) tb=32 fits v5e/v6e (~51 MiB);
    # keep tb~16 on v7x (64 MiB physical VMEM).  w/b could additionally use
    # pipeline_mode=pl.Buffered(1) on v7x (grid-invariant, nothing to
    # pipeline); left at the default here for portability.
    x_block_bytes = tb * S * H_in * 4
    len_block_bytes = tb * 4
    out_block_bytes = tb * H * 4
    w_bytes = H_in * H * 2
    b_bytes = H * 4
    live_bytes = (2 * (x_block_bytes + len_block_bytes + out_block_bytes)
                  + 2 * (w_bytes + b_bytes))
    vmem_limit = min(64 * 1024 * 1024, max(2 * live_bytes, 8 * 1024 * 1024))

    sentence_embedding = pl.pallas_call(
        entity_sbert_kernel,
        out_shape=jax.ShapeDtypeStruct((B, H), jnp.float32),
        grid_spec=pltpu.PrefetchScalarGridSpec(
            num_scalar_prefetch=0,
            grid=(B // tb,),
            in_specs=[
                pl.BlockSpec((tb, S, H_in), lambda i: (i, 0, 0)),
                pl.BlockSpec((tb, 1), lambda i: (i, 0)),
                pl.BlockSpec((H_in, H), lambda i: (0, 0)),
                pl.BlockSpec((1, H), lambda i: (0, 0)),
            ],
            out_specs=pl.BlockSpec((tb, H), lambda i: (i, 0)),
        ),
        compiler_params=pltpu.CompilerParams(
            dimension_semantics=("parallel",),   # batch tiles shard across TCs
            vmem_limit_bytes=vmem_limit),
    )(x, lengths, w_bf16, b2)

    out_features = dict(features)
    out_features["sentence_embedding"] = sentence_embedding
    return out_features


if __name__ == "__main__":
    # Small but alignment-friendly shapes: B=32 -> 2 grid steps of TB=16,
    # S=16, hidden dims 128-aligned.
    B, S, H_in, H = 32, 16, 128, 128
    TB = 16

    key = jax.random.PRNGKey(0)
    kx, kw, kb, kl = jax.random.split(key, 4)

    x = jax.random.normal(kx, (B, S, H_in), dtype=jnp.float32)
    # Deterministic "parameters" of the synthetic (stand-in) encoder.
    w = jax.random.normal(kw, (H_in, H), dtype=jnp.float32) * 0.1
    b = jax.random.normal(kb, (H,), dtype=jnp.float32) * 0.1

    # Variable-length right-padded attention masks, including a fully padded
    # row (exercises the sum_mask clamp) and a full-length row.
    lengths = jax.random.randint(kl, (B,), 0, S + 1)
    lengths = lengths.at[0].set(0).at[1].set(S)
    attention_mask = (jnp.arange(S)[None, :] < lengths[:, None]).astype(jnp.int32)

    features = {"input_embeds": x, "attention_mask": attention_mask}

    out = entity_sbert_forward(features, w, b, tb=TB)
    sent = jax.block_until_ready(out["sentence_embedding"])

    # Pure-JAX reference mirroring the kernel's dtype path exactly:
    # f32 masked-mean pooling, bf16 MXU operands, f32 accumulate, f32 bias.
    m = attention_mask.astype(jnp.float32)
    pooled_ref = jnp.sum(x * m[:, :, None], axis=1)
    denom_ref = jnp.maximum(m.sum(axis=1, keepdims=True), 1e-9)
    mean_ref = pooled_ref / denom_ref
    ref = jnp.dot(mean_ref.astype(jnp.bfloat16), w.astype(jnp.bfloat16),
                  preferred_element_type=jnp.float32) + b[None, :]

    assert sent.shape == (B, H)
    max_err = float(jnp.max(jnp.abs(sent - ref)))
    assert jnp.allclose(sent, ref, atol=5e-3, rtol=5e-3), (
        f"mismatch vs reference (max abs err {max_err})")
    print("KERNEL_OK")
</pallas_src>

<mosaic_0001>
module attributes {stable_mosaic.version = 11 : i64} {
  func.func @entity_sbert_kernel(%arg0: i32, %arg1: memref<16x16x128xf32, #tpu.memory_space<vmem>>, %arg2: memref<16x1xi32, #tpu.memory_space<vmem>>, %arg3: memref<128x128xbf16, #tpu.memory_space<vmem>>, %arg4: memref<1x128xf32, #tpu.memory_space<vmem>>, %arg5: memref<16x128xf32, #tpu.memory_space<vmem>>) attributes {dimension_semantics = [#tpu.dimension_semantics<parallel>], iteration_bounds = array<i64: 2>, scalar_prefetch = 0 : i64, scratch_operands = 0 : i64, tpu.core_type = #tpu.core_type<tc>, window_params = [{transform_indices = @transform_0, window_bounds = array<i64: 16, 16, 128>}, {transform_indices = @transform_1, window_bounds = array<i64: 16, 1>}, {pipeline_mode = #tpu.pipeline_mode<synchronous>, transform_indices = @transform_2, window_bounds = array<i64: 128, 128>}, {pipeline_mode = #tpu.pipeline_mode<synchronous>, transform_indices = @transform_3, window_bounds = array<i64: 1, 128>}, {transform_indices = @transform_4, window_bounds = array<i64: 16, 128>}]} {
    %c0 = arith.constant 0 : index
    %c0_0 = arith.constant 0 : index
    %c0_1 = arith.constant 0 : index
    %0 = vector.load %arg1[%c0, %c0_0, %c0_1] : memref<16x16x128xf32, #tpu.memory_space<vmem>>, vector<16x16x128xf32>
    %c0_2 = arith.constant 0 : index
    %c0_3 = arith.constant 0 : index
    %1 = vector.load %arg2[%c0_2, %c0_3] : memref<16x1xi32, #tpu.memory_space<vmem>>, vector<16x1xi32>
    %2 = tpu.iota {dimensions = array<i32: 1>} : vector<16x16x128xi32>
    %3 = vector.shape_cast %1 : vector<16x1xi32> to vector<16x1x1xi32>
    %4 = vector.broadcast %3 : vector<16x1x1xi32> to vector<16x16x128xi32>
    %5 = arith.cmpi slt, %2, %4 : vector<16x16x128xi32>
    %cst = arith.constant 0.000000e+00 : f32
    %6 = vector.broadcast %cst : f32 to vector<16x16x128xf32>
    %7 = arith.select %5, %0, %6 : vector<16x16x128xi1>, vector<16x16x128xf32>
    %cst_4 = arith.constant dense<0.000000e+00> : vector<16x128xf32>
    %8 = vector.multi_reduction <add>, %7, %cst_4 [1] : vector<16x16x128xf32> to vector<16x128xf32>
    %9 = arith.sitofp %1 : vector<16x1xi32> to vector<16x1xf32>
    %cst_5 = arith.constant 9.99999971E-10 : f32
    %10 = vector.broadcast %cst_5 : f32 to vector<16x1xf32>
    %11 = arith.maximumf %9, %10 : vector<16x1xf32>
    %12 = vector.broadcast %11 : vector<16x1xf32> to vector<16x128xf32>
    %13 = arith.divf %8, %12 : vector<16x128xf32>
    %14 = arith.truncf %13 : vector<16x128xf32> to vector<16x128xbf16>
    %c0_6 = arith.constant 0 : index
    %c0_7 = arith.constant 0 : index
    %15 = vector.load %arg3[%c0_6, %c0_7] : memref<128x128xbf16, #tpu.memory_space<vmem>>, vector<128x128xbf16>
    %cst_8 = arith.constant dense<0.000000e+00> : vector<16x128xf32>
    %16 = tpu.matmul %14, %15, %cst_8 {dimension_numbers = #tpu.dot_dimension_numbers<[1], [0], [0], [1], [0, 0, 1, 1], [], []>} : vector<16x128xbf16>, vector<128x128xbf16>, vector<16x128xf32> -> vector<16x128xf32>
    %c0_9 = arith.constant 0 : index
    %c0_10 = arith.constant 0 : index
    %17 = vector.load %arg4[%c0_9, %c0_10] : memref<1x128xf32, #tpu.memory_space<vmem>>, vector<1x128xf32>
    %18 = vector.broadcast %17 : vector<1x128xf32> to vector<16x128xf32>
    %19 = arith.addf %16, %18 : vector<16x128xf32>
    %c0_11 = arith.constant 0 : index
    %c0_12 = arith.constant 0 : index
    %20 = vector.load %arg5[%c0_11, %c0_12] : memref<16x128xf32, #tpu.memory_space<vmem>>, vector<16x128xf32>
    tpu.vector_store %arg5[%c0_11, %c0_12], %19 {strides = array<i32>} : memref<16x128xf32, #tpu.memory_space<vmem>>, vector<16x128xf32>,
    return
  }
  func.func @transform_0(%arg0: i32) -> (i32, i32, i32) {
    %c0_i32 = arith.constant 0 : i32
    %c0_i32_0 = arith.constant 0 : i32
    %c0_i32_1 = arith.constant 0 : i32
    return %arg0, %c0_i32, %c0_i32_0 : i32, i32, i32
  }
  func.func @transform_1(%arg0: i32) -> (i32, i32) {
    %c0_i32 = arith.constant 0 : i32
    %c0_i32_0 = arith.constant 0 : i32
    return %arg0, %c0_i32 : i32, i32
  }
  func.func @transform_2(%arg0: i32) -> (i32, i32) {
    %c0_i32 = arith.constant 0 : i32
    %c0_i32_0 = arith.constant 0 : i32
    %c0_i32_1 = arith.constant 0 : i32
    return %c0_i32, %c0_i32_0 : i32, i32
  }
  func.func @transform_3(%arg0: i32) -> (i32, i32) {
    %c0_i32 = arith.constant 0 : i32
    %c0_i32_0 = arith.constant 0 : i32
    %c0_i32_1 = arith.constant 0 : i32
    return %c0_i32, %c0_i32_0 : i32, i32
  }
  func.func @transform_4(%arg0: i32) -> (i32, i32) {
    %c0_i32 = arith.constant 0 : i32
    %c0_i32_0 = arith.constant 0 : i32
    return %arg0, %c0_i32 : i32, i32
  }
}

</mosaic_0001>

<bundles_post_ra>
// kernel: tpu_custom_call.1
= control target key start
LH: loop header
LB: loop body
LE: loop exit
PB: predicated region body
PF: predicated region fallthrough
CT: control target
= control target key end

     0   :  { %9 = vsyncpa [#allocation3], 0  ;;  %s1738_s0 = inlined_call_operand.hbm [shape: f32[32,16,128], index: 0, kind: input, shape index: {}]   ;;  %s1739_s1 = inlined_call_operand.vmem [shape: s32[32,1], index: 1, kind: input, shape index: {}]   ;;  %s1740_s2 = inlined_call_operand.hbm [shape: bf16[128,128], index: 2, kind: input, shape index: {}]   ;;  %s1741_s3 = inlined_call_operand.vmem [shape: f32[1,128], index: 3, kind: input, shape index: {}]   ;;  %s1742_s4 = inlined_call_operand.hbm [shape: f32[32,128], index: 4, kind: output, shape index: {}]  }
   0x1   :  { %11 = vsyncpa [#allocation3 + $0x1], 0 }
   0x2   :  { %12 = vsyncpa [#allocation6], 0 }
   0x3   :  { %13 = vsyncpa [#allocation4], 0 }
   0x4   :  { %15 = vsyncpa [#allocation4 + $0x1], 0  ;;  %s1395_s15 = smov 0   ;;  %s1397_s16 = smov 0  }
   0x5   :  { %s1399_s17 = smov 0   ;;  %s1401_s18 = smov 0  }
   0x6 LB: > { %s1416_s19 = sadd.s32 4294967295, %s1355_s18   ;;  %s1062_s20 = sadd.s32 4294967294, %s1355_s18   ;;  %s1355_s18 = sphi %s1401_s18, %s1764_s18   ;;  %s1351_s17 = sphi %s1399_s17, %s1763_s17   ;;  %s1347_s16 = sphi %s1397_s16, %s1762_s16   ;;  %s1343_s15 = sphi %s1395_s15, %s1761_s15  }
   0x7   : > { %p41_p0 = scmp.ne.s32.totalorder %s1347_s16, %s1343_s15  ;;  %p1743_p1 = scmp.eq.s32.totalorder %s1416_s19, 0 }
   0x8   : > { %p139_p3 = scmp.eq.s32.totalorder %s1062_s20, 1  ;;  %p1063_p5 = scmp.ge.s32.totalorder %s1355_s18, 1 }
   0x9   : > { %p1425_p4 = por %p1743_p1, %p41_p0  ;;  %p146_p7 = scmp.lt.s32.totalorder %s1355_s18, 3 }
   0xa   : > { %p1430_p6 = por %p139_p3, %p41_p0  ;;  %s1357_s24 = smov [#allocation5]  }
   0xb   : > { %s1747_s21 = scalar_select %p1425_p4, 1, 0 }
   0xc   : > { %s1748_s22 = scalar_select %p1430_p6, 1, 0 }
   0xd   : > { %p1435_p8 = pnand %p1063_p5, %p146_p7  ;;  %s158_s25 = sshll.u32 %s1357_s24, 4  ;;  %s159_s25 = int_to_ptr.vmem [resolvable:$true] %s158_s25 }
   0xe   : > { %s1449_s27 = sadd.s32 1, %s1355_s18   ;;  %s28_s28 = sadd.s32 1, %s1351_s17 }
   0xf   : > { %s1749_s23 = scalar_select %p1435_p8, 1, 0 }
  0x10   : > { %p1130_p9 = pneg %p1435_p8  ;;  %s25_s29 = ssub.s32 %s1355_s18, %s1449_s27 }
  0x11   : > { %s1244_s30 = scalar_lea.vmem %s159_s25, 1024  ;;  %p1252_p5 = scmp.lt.s32.totalorder %s159_s25, %s159_s25 }
  0x12   : > { %p1444_p11 = pnand %p1130_p9, %p1743_p1  ;;  %p1245_p13 = scmp.ne.s32.totalorder %s159_s25, %s1244_s30 }
  0x13   : > { %p1253_p7 = scmp.lt.s32.totalorder %s1244_s30, %s1244_s30 }
  0x14   : > { %p1235_p12 = pneg %p1444_p11 }
  0x15   : > { %p1254_p10 = por %p1253_p7, %p1252_p5 }
  0x16   : > { %p1247_p0 = pnand %p1245_p13, %p1235_p12 }
  0x18   : > { %p1248_p3 = pneg %p1247_p0 }
  0x1a   : > { %p1255_p2 = pnand %p1254_p10, %p1248_p3 }
  0x1c   : > { %1258 = shalt.err (!%p1255_p2)
}
  0x1d   : > { %s1358_s5 = smov 64   ;;  %s1359_s6 = smov 4  }
  0x1e   : > { %1133 = dma.hbm_to_vmem [thread:$0]  (!%p1444_p11), %s1740_s2, 1024, %s159_s25, [#allocation6], %s1358_s5, %s1358_s5, %s1359_s6  }
  0x1f   : > { %p26_p9 = scmp.eq.s32.totalorder %s25_s29, 0  ;;  %p35_p12 = scmp.ne.s32.totalorder %s1351_s17, %s1347_s16 }
  0x20   : > { %p36_p10 = scmp.eq.s32.totalorder %s1355_s18, 0  ;;  %p1143_p2 = scmp.lt.s32.totalorder %s1355_s18, 2 }
  0x21   : > { %s1466_s9 = scalar_select %p26_p9, %s1351_s17, %s28_s28  }
  0x22   : > { %p37_p13 = por %p36_p10, %p35_p12  ;;  %p1751_p0 = scmp.eq.s32.totalorder %s1416_s19, 1 }
  0x23   : > { %s175_s11 = sand.u32 1, %s1351_s17   ;;  %s1091_s12 = sshll.u32 %s1355_s18, 12 }
  0x24   : > { %p1470_p3 = por %p1751_p0, %p35_p12  ;;  %s1066_s13 = sshll.u32 %s175_s11, 8 }
  0x25   : > { %s1479_s24 = scalar_lea.hbm %s1738_s0, %s1091_s12  ;;  %s179_s25 = scalar_lea.vmem [#allocation2], %s1066_s13 }
  0x26   : > { %s1752_s10 = scalar_select %p1470_p3, 1, 0 }
  0x27   : > { %s187_s26 = sshll.u32 %s179_s25, 4  ;;  %p1481_p11 = pnand %p1143_p2, %p37_p13  ;;  %s1485_s26 = int_to_ptr.vmem [resolvable:$true] %s187_s26 }
  0x28   : > { %s1487_s29 = scalar_lea.sflag [#allocation3], %s175_s11  ;;  %s1259_s30 = scalar_lea.hbm %s1479_s24, 4096 }
  0x29   : > { %p1260_p5 = scmp.ne.s32.totalorder %s1479_s24, %s1259_s30  ;;  %p1261_p7 = pneg %p1481_p11 }
  0x2a   : > { %s1264_s7 = scalar_lea.hbm %s1738_s0, 8192  ;;  %p1265_p10 = scmp.lt.s32.totalorder %s1479_s24, %s1738_s0 }
  0x2b   : > { %p1262_p9 = pnand %p1261_p7, %p1260_p5  ;;  %p1266_p2 = scmp.lt.s32.totalorder %s1264_s7, %s1259_s30 }
  0x2d   : > { %p1263_p12 = pneg %p1262_p9  ;;  %p1267_p13 = por %p1266_p2, %p1265_p10 }
  0x2f   : > { %p1268_p0 = pnand %p1267_p13, %p1263_p12 }
  0x31   : > { %1271 = shalt.err (!%p1268_p0)
}
  0x32   : > { %s1272_s11 = scalar_lea.vmem %s1485_s26, 4096  ;;  %s1360_s13 = smov [#allocation2]  }
  0x33   : > { %p1273_p1 = scmp.ne.s32.totalorder %s1485_s26, %s1272_s11  ;;  %s1277_s14 = sshll.u32 %s1360_s13, 4  ;;  %s1278_s14 = int_to_ptr.vmem [resolvable:$false] %s1277_s14 }
  0x34   : > { %s1279_s20 = scalar_lea.vmem %s1278_s14, 8192  ;;  %p1280_p9 = scmp.lt.s32.totalorder %s1485_s26, %s1278_s14 }
  0x35   : > { %p1275_p6 = pnand %p1273_p1, %p1261_p7  ;;  %p1281_p3 = scmp.lt.s32.totalorder %s1279_s20, %s1272_s11 }
  0x37   : > { %p1276_p5 = pneg %p1275_p6  ;;  %p1282_p4 = por %p1281_p3, %p1280_p9 }
  0x39   : > { %p1283_p8 = pnand %p1282_p4, %p1276_p5 }
  0x3b   : > { %1286 = shalt.err (!%p1283_p8)
}
  0x3c   : > { %s1361_s25 = smov 128   ;;  %s1362_s30 = smov 8  }
  0x3d   : > { %1137 = dma.hbm_to_vmem [thread:$0]  (!%p1481_p11), %s1479_s24, 4096, %s1485_s26, %s1487_s29, %s1361_s25, %s1361_s25, %s1362_s30  }
  0x3e   : > { %p1754_p1 = scmp.ne.s32.totalorder %s1749_s23, 0 }
  0x3f   : > { %s1511_s5 = sand.u32 (!%p1754_p1), 1, %s1347_s16   ;;  %p1755_p4 = scmp.ne.s32.totalorder (!%p1754_p1), %s1747_s21, 0 }
  0x40   : > { %208 = sbr.rel (%p1754_p1) target bundleno = 498 (0x1f2), region = 36  ;;  %s1071_s6 = sshll.u32 (!%p1754_p1), %s1511_s5, 8 }
  0x41   : > { %s211_s7 = scalar_lea.sflag (!%p1754_p1), [#allocation3], %s1511_s5  ;;  %s1515_s8 = scalar_lea.vmem (!%p1754_p1), [#allocation2], %s1071_s6 }
  0x45   : > { %1330 = dma.done.wait (%p1755_p4), %s211_s7, 4096  }
  0x46   : > { %1332 = vsyncadd (%p1755_p4), %s211_s7, 4294963200  ;;  %p1756_p6 = scmp.eq.s32.totalorder %s1416_s19, 0 }
  0x48   : > { %1334 = dma.done.wait (%p1756_p6), [#allocation6], 1024   ;;  %p1757_p8 = pmov %p1756_p6 }
  0x49   : > { %s1074_s23 = sshll.u32 %s1416_s19, 1  ;;  %v291_v0 = vlaneseq  ;;  %v1363_v1 = vmov 0   ;;  %v1364_v2 = vmov 1966171168   ;;  %v1365_v56 = vmov 0.0   ;;  %v1193_v57 = vld [vmem:[#allocation5 + $0x38] sm:$0xff]  }
  0x4a   : > { %1336 = vsyncadd (%p1757_p8), [#allocation6], 4294966272  ;;  %1189 = vset.pattern.permute.xlu1 %v1363_v1  ;;  %p250_p3 = scmp.lt.s32.totalorder %s1074_s23, 3  ;;  %1190 = vset.pattern.permute.xlu0 %v1363_v1  ;;  %v296_v3 = vunpack.c.l.s4 %v1364_v2  ;;  %v1194_v58 = vld [vmem:[#allocation5 + $0x30] sm:$0xff]   ;;  %v1195_v59 = vld [vmem:[#allocation5 + $0x28] sm:$0xff]   ;;  %vm1366_vm0 = vmmov 0  }
  0x4b   : > { %v1526_v4 = vshrl.u32 %v291_v0, 7  ;;  %1102 = vmatprep.subr.bf16.mxu0 %v1365_v56  ;;  %v1196_v60 = vld [vmem:[#allocation5 + $0x20] sm:$0xff]   ;;  %v1197_v61 = vld [vmem:[#allocation5 + $0x18] sm:$0xff]   ;;  %v1198_v62 = vld [vmem:[#allocation5 + $0x10] sm:$0xff]   ;;  %1118 = vmatprep.mubr.msk.bf16.mxu0 %vm1366_vm0, %v1365_v56  ;;  %s1073_s29 = sshll.u32 %s1511_s5, 4  ;;  %s1092_s20 = sshll.u32 %s1416_s19, 8 }
  0x4c   : > { %s1766_s23 = smov (!%p250_p3, %s1074_s23), 3  ;;  %v297_v5 = vunpack.c.0.s8 %v296_v3  ;;  %1103 = vmatpush3.bf16.msra.mxu0 %v1193_v57  ;;  %v1199_v63 = vld [vmem:[#allocation5 + $0x8] sm:$0xff]   ;;  %v1200_v0 = vld [vmem:[#allocation5] sm:$0xff]   ;;  %s247_s13 = scalar_lea.vmem [#allocation7], %s1073_s29 }
  0x4d   : > { %s1075_s21 = sshll.u32 %s1766_s23, 3  ;;  %v394_v9 = vsub.s32 0, %v1526_v4  ;;  %1104 = vmatprep.subr.bf16.mxu0 %v1365_v56  ;;  %v1534_v1 = vadd.s32 8, %v1526_v4  ;;  %v257_v3 = vld [vmem:[%s1515_s8] sm:$0xff]  ;;  %s967_s14 = sshll.u32 %s247_s13, 4  ;;  %s1690_s14 = int_to_ptr.vmem [resolvable:$true] %s967_s14 }
  0x4e   : > { %v300_v6 = vsub.s32 %v297_v5, %v1526_v4  ;;  %s253_s28 = scalar_lea.vmem %s1739_s1, %s1075_s21  ;;  %v258_v5 = vld [vmem:[%s1515_s8 + $0x8] sm:$0xff]  ;;  %s1695_s6 = scalar_lea.hbm %s1742_s4, %s1092_s20 }
  0x4f   : > { %v289_v7 = vld [vmem:[%s253_s28] sm:$0xff]  ;;  %v290_v8 = vld [vmem:[%s253_s28 + $0x8] sm:$0xff]  ;;  %s954_s7 = scalar_lea.sflag [#allocation4], %s1511_s5  ;;  %p1758_p7 = scmp.ne.s32.totalorder %s1752_s10, 0 }
  0x50   : > { %v680_v10 = vcvt.s32.f32 %v289_v7  ;;  %v301_v11 = vrot.slane %v289_v7, %v300_v6  ;;  %v681_v12 = vcvt.s32.f32 %v290_v8  ;;  %v350_v13 = vrot.slane %v290_v8, %v300_v6  ;;  %1105 = vmatpush3.bf16.msra.mxu0 %v1194_v58  ;;  %s1367_s19 = smov [#allocation7]  }
  0x51   : > { %v343_v24 = vcombine.high %v290_v8, %v290_v8  ;;  %v294_v28 = vcombine.high %v289_v7, %v289_v7  ;;  %1106 = vmatprep.subr.bf16.mxu0 %v1365_v56  ;;  %s1291_s23 = sshll.u32 %s1367_s19, 4  ;;  %s1292_s23 = int_to_ptr.vmem [resolvable:$false] %s1291_s23 }
  0x52   : > { %v682_v14 = vmax.f32 %v680_v10, 1e-09  ;;  %v317_v15 = vrot.slane %v301_v11, %v300_v6  ;;  %v309_v16 = vcombine.high %v301_v11, %v301_v11  ;;  %v683_v17 = vmax.f32 %v681_v12, 1e-09  ;;  %v273_v12 = vld [vmem:[%s1515_s8 + $0x80] sm:$0xff]  ;;  %s1293_s21 = scalar_lea.vmem %s1292_s23, 512  ;;  %p1294_p2 = scmp.lt.s32.totalorder %s1690_s14, %s1292_s23 }
  0x53   : > { %v366_v18 = vrot.slane %v350_v13, %v300_v6  ;;  %v358_v21 = vcombine.high %v350_v13, %v350_v13  ;;  %v357_v32 = vrot.slane %v343_v24, %v300_v6  ;;  %v308_v35 = vrot.slane %v294_v28, %v300_v6  ;;  %v274_v13 = vld [vmem:[%s1515_s8 + $0x88] sm:$0xff]  ;;  %v259_v24 = vld [vmem:[%s1515_s8 + $0x10] sm:$0xff] }
  0x54   : > { %686 = vperm.xlu1 %1189, %v682_v14   ;;  %v395_v19 = vrot.slane %v317_v15, %v394_v9  ;;  %v331_v20 = vrot.slane %v309_v16, %v300_v6  ;;  %v339_v33 = vcombine.high %v317_v15, %v317_v15  ;;  %1107 = vmatpush3.bf16.msra.mxu0 %v1195_v59  ;;  %v277_v15 = vld [vmem:[%s1515_s8 + $0xa0] sm:$0xff]  ;;  %v278_v16 = vld [vmem:[%s1515_s8 + $0xa8] sm:$0xff] }
  0x55   : > { %v388_v22 = vcombine.high %v366_v18, %v366_v18  ;;  %v427_v23 = vrot.slane %v366_v18, %v394_v9  ;;  %v380_v27 = vrot.slane %v358_v21, %v300_v6  ;;  %v373_v37 = vrot.slane %v357_v32, %v300_v6  ;;  %1108 = vmatprep.subr.bf16.mxu0 %v1365_v56 }
  0x56   : > { %457 = vperm.xlu0 %1190, %v395_v19   ;;  %v341_v26 = vcombine.high %v331_v20, %v331_v20  ;;  %v399_v29 = vrot.slane %v331_v20, %v394_v9  ;;  %v359_v38 = vcombine.high %v357_v32, %v357_v32  ;;  %v403_v39 = vrot.slane %v339_v33, %v394_v9 }
  0x57   : > { %v435_v25 = vrot.slane %v388_v22, %v394_v9  ;;  %v390_v31 = vcombine.high %v380_v27, %v380_v27  ;;  %v431_v34 = vrot.slane %v380_v27, %v394_v9  ;;  %v324_v40 = vrot.slane %v308_v35, %v300_v6 }
  0x58   : > { %690 = vperm.xlu1 %1189, %v683_v17   ;;  %v407_v30 = vrot.slane %v341_v26, %v394_v9  ;;  %v310_v41 = vcombine.high %v308_v35, %v308_v35  ;;  %v443_v42 = vrot.slane %v373_v37, %v394_v9  ;;  %v387_v43 = vrot.slane %v359_v38, %v300_v6 }
  0x59   : > { %v439_v36 = vrot.slane %v390_v31, %v394_v9  ;;  %v411_v44 = vrot.slane %v324_v40, %v394_v9  ;;  %v389_v47 = vcombine.high %v373_v37, %v373_v37  ;;  %v340_v49 = vcombine.high %v324_v40, %v324_v40  ;;  %1109 = vmatpush3.bf16.msra.mxu0 %v1196_v60 }
  0x5a   : > { %481 = vperm.xlu0 %1190, %v427_v23   ;;  %v338_v45 = vrot.slane %v310_v41, %v300_v6  ;;  %v447_v46 = vrot.slane %v387_v43, %v394_v9  ;;  %v391_v51 = vcombine.high %v387_v43, %v387_v43  ;;  %1110 = vmatprep.subr.bf16.mxu0 %v1365_v56  ;;  %v275_v41 = vld [vmem:[%s1515_s8 + $0x90] sm:$0xff] }
  0x5b   : > { %v451_v50 = vrot.slane %v389_v47, %v394_v9  ;;  %v419_v52 = vrot.slane %v340_v49, %v394_v9  ;;  %v264_v47 = vld [vmem:[%s1515_s8 + $0x38] sm:$0xff] }
  0x5c   : > { %487 = vperm.xlu1 %1189, %v435_v25   ;;  %v415_v48 = vrot.slane %v338_v45, %v394_v9  ;;  %v342_v53 = vcombine.high %v338_v45, %v338_v45  ;;  %v455_v54 = vrot.slane %v391_v51, %v394_v9  ;;  %v260_v25 = vld [vmem:[%s1515_s8 + $0x18] sm:$0xff] }
  0x5d   : > { %1111 = vmatpush3.bf16.msra.mxu0 %v1197_v61 }
  0x5e   : > { %460 = vperm.xlu0 %1190, %v399_v29   ;;  %v423_v55 = vrot.slane %v342_v53, %v394_v9  ;;  %1112 = vmatprep.subr.bf16.mxu0 %v1365_v56 }
  0x60   : > { %466 = vperm.xlu1 %1189, %v407_v30  }
  0x61   : > { %1113 = vmatpush3.bf16.msra.mxu0 %v1198_v62 }
  0x62   : > { %484 = vperm.xlu0 %1190, %v431_v34   ;;  %1114 = vmatprep.subr.bf16.mxu0 %v1365_v56 }
  0x64   : > { %490 = vperm.xlu1 %1189, %v439_v36  }
  0x65   : > { %1115 = vmatpush3.bf16.msra.mxu0 %v1199_v63 }
  0x66   : > { %463 = vperm.xlu0 %1190, %v403_v39   ;;  %1116 = vmatprep.subr.bf16.mxu0 %v1365_v56 }
  0x68   : > { %493 = vperm.xlu1 %1189, %v443_v42   ;;  %v276_v42 = vld [vmem:[%s1515_s8 + $0x98] sm:$0xff] }
  0x69   : > { %1117 = vmatpush3.bf16.msra.mxu0 %v1200_v0 }
  0x6a   : > { %469 = vperm.xlu0 %1190, %v411_v44  }
  0x6c   : > { %496 = vperm.xlu1 %1189, %v447_v46   ;;  %v263_v46 = vld [vmem:[%s1515_s8 + $0x30] sm:$0xff] }
  0x6e   : > { %472 = vperm.xlu0 %1190, %v415_v48  }
  0x70   : > { %499 = vperm.xlu1 %1189, %v451_v50  }
  0x72   : > { %475 = vperm.xlu0 %1190, %v419_v52  }
  0x74   : > { %502 = vperm.xlu1 %1189, %v455_v54  }
  0x76   : > { %478 = vperm.xlu0 %1190, %v423_v55  }
  0xcf   : > { %v1536_v2 = vpop.permute.xlu1 %686 }
  0xd0   : > { %v692_v26 = vrot.slane %v1536_v2, 1  ;;  %v693_v28 = vrot.slane %v1536_v2, 2  ;;  %v694_v30 = vrot.slane %v1536_v2, 3  ;;  %1201 = vrcp.f32 %v1536_v2 }
  0xd1   : > { %v458_v6 = vpop.permute.xlu0 %457  ;;  %v695_v37 = vrot.slane %v1536_v2, 4  ;;  %v696_v38 = vrot.slane %v1536_v2, 5  ;;  %v697_v43 = vrot.slane %v1536_v2, 6  ;;  %v698_v48 = vrot.slane %v1536_v2, 7 }
  0xd2   : > { %vm504_vm1 = vcmp.lt.s32.totalorder %v1526_v4, %v458_v6  ;;  %vm505_vm2 = vcmp.lt.s32.totalorder %v1534_v1, %v458_v6  ;;  %1203 = vrcp.f32 %v692_v26  ;;  %v261_v6 = vld [vmem:[%s1515_s8 + $0x20] sm:$0xff] }
  0xd3   : > { %v536_v7 = vsel %vm504_vm1, %v257_v3, 0.0  ;;  %v537_v8 = vsel %vm505_vm2, %v258_v5, 0.0  ;;  %v1542_v9 = vpop.permute.xlu1 %690  ;;  %1205 = vrcp.f32 %v693_v28 }
  0xd4   : > { %v568_v10 = vadd.f32 %v537_v8, %v536_v7  ;;  %1207 = vrcp.f32 %v694_v30  ;;  %v699_v52 = vrot.slane %v1542_v9, 1  ;;  %v700_v55 = vrot.slane %v1542_v9, 2  ;;  %v262_v7 = vld [vmem:[%s1515_s8 + $0x28] sm:$0xff]  ;;  %v279_v8 = vld [vmem:[%s1515_s8 + $0xb0] sm:$0xff] }
  0xd5   : > { %v482_v11 = vpop.permute.xlu0 %481  ;;  %1209 = vrcp.f32 %v695_v37  ;;  %v701_v62 = vrot.slane %v1542_v9, 3  ;;  %v702_v63 = vrot.slane %v1542_v9, 4  ;;  %v703_v0 = vrot.slane %v1542_v9, 5 }
  0xd6   : > { %vm520_vm3 = vcmp.lt.s32.totalorder %v1526_v4, %v482_v11  ;;  %vm521_vm4 = vcmp.lt.s32.totalorder %v1534_v1, %v482_v11  ;;  %v569_v17 = vrot.slane %v568_v10, 4  ;;  %1211 = vrcp.f32 %v1542_v9 }
  0xd7   : > { %v488_v14 = vpop.permute.xlu1 %487  ;;  %v552_v18 = vsel %vm520_vm3, %v273_v12, 0.0  ;;  %v553_v19 = vsel %vm521_vm4, %v274_v13, 0.0  ;;  %1213 = vrcp.f32 %v696_v38 }
  0xd8   : > { %v624_v20 = vadd.f32 %v553_v19, %v552_v18  ;;  %vm524_vm5 = vcmp.lt.s32.totalorder %v1526_v4, %v488_v14  ;;  %vm525_vm6 = vcmp.lt.s32.totalorder %v1534_v1, %v488_v14  ;;  %v570_v29 = vadd.f32 %v569_v17, %v568_v10  ;;  %v280_v10 = vld [vmem:[%s1515_s8 + $0xb8] sm:$0xff] }
  0xd9   : > { %v461_v21 = vpop.permute.xlu0 %460  ;;  %v556_v22 = vsel %vm524_vm5, %v277_v15, 0.0  ;;  %v557_v23 = vsel %vm525_vm6, %v278_v16, 0.0  ;;  %1215 = vrcp.f32 %v697_v43  ;;  %v704_v16 = vrot.slane %v1542_v9, 6  ;;  %v266_v43 = vld [vmem:[%s1515_s8 + $0x48] sm:$0xff] }
  0xda   : > { %v625_v27 = vrot.slane %v624_v20, 4  ;;  %vm506_vm7 = vcmp.lt.s32.totalorder %v1526_v4, %v461_v21  ;;  %vm507_vm8 = vcmp.lt.s32.totalorder %v1534_v1, %v461_v21  ;;  %v638_v31 = vadd.f32 %v557_v23, %v556_v22 }
  0xdb   : > { %v538_v32 = vsel %vm506_vm7, %v259_v24, 0.0  ;;  %v539_v33 = vsel %vm507_vm8, %v260_v25, 0.0  ;;  %v467_v35 = vpop.permute.xlu1 %466  ;;  %v571_v39 = vrot.slane %v570_v29, 2  ;;  %1217 = vrcp.f32 %v698_v48  ;;  %v281_v24 = vld [vmem:[%s1515_s8 + $0xc0] sm:$0xff]  ;;  %v282_v25 = vld [vmem:[%s1515_s8 + $0xc8] sm:$0xff] }
  0xdc   : > { %v626_v34 = vadd.f32 %v625_v27, %v624_v20  ;;  %v575_v40 = vadd.f32 %v539_v33, %v538_v32  ;;  %v639_v44 = vrot.slane %v638_v31, 4  ;;  %vm510_vm10 = vcmp.lt.s32.totalorder %v1526_v4, %v467_v35 }
  0xdd   : > { %v485_v36 = vpop.permute.xlu0 %484  ;;  %vm511_vm11 = vcmp.lt.s32.totalorder %v1534_v1, %v467_v35  ;;  %v572_v51 = vadd.f32 %v571_v39, %v570_v29  ;;  %v542_v56 = vsel %vm510_vm10, %v263_v46, 0.0  ;;  %1219 = vrcp.f32 %v699_v52  ;;  %v1202_v15 = vpop.eup %1201 }
  0xde   : > { %vm522_vm9 = vcmp.lt.s32.totalorder %v1526_v4, %v485_v36  ;;  %v627_v45 = vrot.slane %v626_v34, 2  ;;  %vm523_vm12 = vcmp.lt.s32.totalorder %v1534_v1, %v485_v36  ;;  %v576_v53 = vrot.slane %v575_v40, 4 }
  0xdf   : > { %v554_v49 = vsel %vm522_vm9, %v275_v41, 0.0  ;;  %v555_v50 = vsel %vm523_vm12, %v276_v42, 0.0  ;;  %v491_v54 = vpop.permute.xlu1 %490  ;;  %v543_v57 = vsel %vm511_vm11, %v264_v47, 0.0  ;;  %v640_v59 = vadd.f32 %v639_v44, %v638_v31  ;;  %v1587_v19 = vpop.eup %1203  ;;  %v265_v42 = vld [vmem:[%s1515_s8 + $0x40] sm:$0xff] }
  0xe0   : > { %v628_v58 = vadd.f32 %v627_v45, %v626_v34  ;;  %v631_v60 = vadd.f32 %v555_v50, %v554_v49  ;;  %v573_v2 = vrot.slane %v572_v51, 1  ;;  %v577_v3 = vadd.f32 %v576_v53, %v575_v40  ;;  %v1595_v26 = vpop.eup %1205 }
  0xe1   : > { %v464_v61 = vpop.permute.xlu0 %463  ;;  %v589_v5 = vadd.f32 %v543_v57, %v542_v56  ;;  %vm526_vm13 = vcmp.lt.s32.totalorder %v1526_v4, %v491_v54  ;;  %vm527_vm14 = vcmp.lt.s32.totalorder %v1534_v1, %v491_v54  ;;  %1221 = vrcp.f32 %v700_v55  ;;  %v1599_v29 = vpop.eup %1207 }
  0xe2   : > { %vm508_vm15 = vcmp.lt.s32.totalorder %v1526_v4, %v464_v61  ;;  %vm509_vm0 = vcmp.lt.s32.totalorder %v1534_v1, %v464_v61  ;;  %v629_v11 = vrot.slane %v628_v58, 1  ;;  %v641_v12 = vrot.slane %v640_v59, 2  ;;  %v1601_v38 = vpop.eup %1209 }
  0xe3   : > { %v632_v13 = vrot.slane %v631_v60, 4  ;;  %v494_v14 = vpop.permute.xlu1 %493  ;;  %1223 = vrcp.f32 %v701_v62  ;;  %v540_v17 = vsel %vm508_vm15, %v261_v6, 0.0  ;;  %v541_v18 = vsel %vm509_vm0, %v262_v7, 0.0  ;;  %v1212_v44 = vpop.eup %1211 }
  0xe4   : > { %v574_v20 = vadd.f32 %v573_v2, %v572_v51  ;;  %v578_v21 = vrot.slane %v577_v3, 2  ;;  %v558_v22 = vsel %vm526_vm13, %v279_v8, 0.0  ;;  %v559_v23 = vsel %vm527_vm14, %v280_v10, 0.0  ;;  %v1608_v47 = vpop.eup %1213 }
  0xe5   : > { %v590_v27 = vrot.slane %v589_v5, 4  ;;  %v582_v28 = vadd.f32 %v541_v18, %v540_v17  ;;  %vm528_vm1 = vcmp.lt.s32.totalorder %v1526_v4, %v494_v14  ;;  %vm529_vm2 = vcmp.lt.s32.totalorder %v1534_v1, %v494_v14  ;;  %v470_v33 = vpop.permute.xlu0 %469  ;;  %v267_v17 = vld [vmem:[%s1515_s8 + $0x50] sm:$0xff] }
  0xe6   : > { %1225 = vrcp.f32 %v702_v63  ;;  %v630_v30 = vadd.f32 %v629_v11, %v628_v58  ;;  %v642_v31 = vadd.f32 %v641_v12, %v640_v59  ;;  %v633_v32 = vadd.f32 %v632_v13, %v631_v60  ;;  %v1610_v51 = vpop.eup %1215  ;;  %v283_v59 = vld [vmem:[%s1515_s8 + $0xd0] sm:$0xff] }
  0xe7   : > { %v645_v34 = vadd.f32 %v559_v23, %v558_v22  ;;  %v583_v35 = vrot.slane %v582_v28, 4  ;;  %v560_v36 = vsel %vm528_vm1, %v281_v24, 0.0  ;;  %v561_v37 = vsel %vm529_vm2, %v282_v25, 0.0  ;;  %v268_v23 = vld [vmem:[%s1515_s8 + $0x58] sm:$0xff] }
  0xe8   : > { %v723_v39 = vmul.f32 %v1202_v15, %v574_v20  ;;  %v705_v40 = vrot.slane %v1542_v9, 7  ;;  %1227 = vrcp.f32 %v703_v0  ;;  %v579_v41 = vadd.f32 %v578_v21, %v577_v3  ;;  %v497_v9 = vpop.permute.xlu1 %496  ;;  %v1612_v56 = vpop.eup %1217  ;;  %v284_v0 = vld [vmem:[%s1515_s8 + $0xd8] sm:$0xff] }
  0xe9   : > { %v591_v45 = vadd.f32 %v590_v27, %v589_v5  ;;  %v652_v46 = vadd.f32 %v561_v37, %v560_v36  ;;  %vm512_vm3 = vcmp.lt.s32.totalorder %v1526_v4, %v470_v33  ;;  %vm513_vm4 = vcmp.lt.s32.totalorder %v1534_v1, %v470_v33  ;;  %v473_v2 = vpop.permute.xlu0 %472  ;;  %v286_v36 = vld [vmem:[%s1515_s8 + $0xe8] sm:$0xff] }
  0xea   : > { %1229 = vrcp.f32 %v704_v16  ;;  %v739_v48 = vmul.f32 %v1212_v44, %v630_v30  ;;  %v643_v49 = vrot.slane %v642_v31, 1  ;;  %v634_v50 = vrot.slane %v633_v32, 2  ;;  %v1615_v60 = vpop.eup %1219 }
  0xeb   : > { %v646_v52 = vrot.slane %v645_v34, 4  ;;  %v584_v53 = vadd.f32 %v583_v35, %v582_v28  ;;  %v544_v54 = vsel %vm512_vm3, %v265_v42, 0.0  ;;  %v545_v55 = vsel %vm513_vm4, %v266_v43, 0.0  ;;  %v285_v35 = vld [vmem:[%s1515_s8 + $0xe0] sm:$0xff] }
  0xec   : > { %v754_v57 = vpack.c.bf16 %v723_v39, %v723_v39  ;;  %1231 = vrcp.f32 %v705_v40  ;;  %v580_v58 = vrot.slane %v579_v41, 1  ;;  %v592_v61 = vrot.slane %v591_v45, 2  ;;  %v500_v24 = vpop.permute.xlu1 %499 }
  0xed   : > { %v653_v62 = vrot.slane %v652_v46, 4  ;;  %v596_v63 = vadd.f32 %v545_v55, %v544_v54  ;;  %vm530_vm5 = vcmp.lt.s32.totalorder %v1526_v4, %v497_v9  ;;  %v762_v3 = vpack.c.bf16 %v739_v48, %v739_v48  ;;  %v476_v37 = vpop.permute.xlu0 %475  ;;  %v270_v55 = vld [vmem:[%s1515_s8 + $0x68] sm:$0xff] }
  0xee   : > { %v644_v5 = vadd.f32 %v643_v49, %v642_v31  ;;  %v635_v6 = vadd.f32 %v634_v50, %v633_v32  ;;  %vm531_vm6 = vcmp.lt.s32.totalorder %v1534_v1, %v497_v9  ;;  %v1222_v7 = vpop.eup %1221  ;;  %v647_v8 = vadd.f32 %v646_v52, %v645_v34 }
  0xef   : > { %v585_v10 = vrot.slane %v584_v53, 2  ;;  %v597_v11 = vrot.slane %v596_v63, 4  ;;  %v562_v12 = vsel %vm530_vm5, %v283_v59, 0.0  ;;  %v1622_v14 = vunpack.c.l.b16 %v754_v57 }
  0xf0   : > { %v1620_v13 = vpop.eup %1223  ;;  %v581_v15 = vadd.f32 %v580_v58, %v579_v41  ;;  %v563_v16 = vsel %vm531_vm6, %v284_v0, 0.0  ;;  %vm514_vm7 = vcmp.lt.s32.totalorder %v1526_v4, %v473_v2  ;;  %v593_v18 = vadd.f32 %v592_v61, %v591_v45  ;;  %v503_v57 = vpop.permute.xlu1 %502 }
  0xf1   : > { %v654_v20 = vadd.f32 %v653_v62, %v652_v46  ;;  %v598_v21 = vadd.f32 %v597_v11, %v596_v63  ;;  %v659_v22 = vadd.f32 %v563_v16, %v562_v12  ;;  %v1627_v25 = vunpack.c.l.b16 %v762_v3  ;;  %v269_v46 = vld [vmem:[%s1515_s8 + $0x60] sm:$0xff]  ;;  %v288_v16 = vld [vmem:[%s1515_s8 + $0xf8] sm:$0xff] }
  0xf2   : > { %v1629_v27 = vmul.f32 %v1222_v7, %v644_v5  ;;  %v636_v28 = vrot.slane %v635_v6, 1  ;;  %vm515_vm8 = vcmp.lt.s32.totalorder %v1534_v1, %v473_v2  ;;  %v648_v31 = vrot.slane %v647_v8, 2  ;;  %v287_v5 = vld [vmem:[%s1515_s8 + $0xf0] sm:$0xff] }
  0xf3   : > { %v1632_v30 = vpop.eup %1225  ;;  %v586_v32 = vadd.f32 %v585_v10, %v584_v53  ;;  %v660_v33 = vrot.slane %v659_v22, 4  ;;  %v546_v34 = vsel %vm514_vm7, %v267_v17, 0.0  ;;  %v1637_v39 = vmul.f32 %v1587_v19, %v581_v15  ;;  %v479_v17 = vpop.permute.xlu0 %478 }
  0xf4   : > { %v547_v40 = vsel %vm515_vm8, %v268_v23, 0.0  ;;  %vm532_vm9 = vcmp.lt.s32.totalorder %v1526_v4, %v500_v24  ;;  %vm533_vm10 = vcmp.lt.s32.totalorder %v1534_v1, %v500_v24  ;;  %v594_v42 = vrot.slane %v593_v18, 1 }
  0xf5   : > { %v1641_v41 = vpop.eup %1227  ;;  %v655_v43 = vrot.slane %v654_v20, 2  ;;  %v599_v44 = vrot.slane %v598_v21, 2  ;;  %v661_v45 = vadd.f32 %v660_v33, %v659_v22  ;;  %v603_v48 = vadd.f32 %v547_v40, %v546_v34  ;;  %v272_v40 = vld [vmem:[%s1515_s8 + $0x78] sm:$0xff] }
  0xf6   : > { %v564_v49 = vsel %vm532_vm9, %v285_v35, 0.0  ;;  %v565_v50 = vsel %vm533_vm10, %v286_v36, 0.0  ;;  %vm516_vm11 = vcmp.lt.s32.totalorder %v1526_v4, %v476_v37  ;;  %v637_v9 = vadd.f32 %v636_v28, %v635_v6 }
  0xf7   : > { %v1645_v19 = vpop.eup %1229  ;;  %v649_v52 = vadd.f32 %v648_v31, %v647_v8  ;;  %v587_v53 = vrot.slane %v586_v32, 1  ;;  %v662_v54 = vrot.slane %v661_v45, 2  ;;  %v604_v58 = vrot.slane %v603_v48, 4  ;;  %v271_v31 = vld [vmem:[%s1515_s8 + $0x70] sm:$0xff]  ;;  %s1287_s8 = scalar_lea.vmem %s1690_s14, 256 }
  0xf8   : > { %v666_v59 = vadd.f32 %v565_v50, %v564_v49  ;;  %vm517_vm12 = vcmp.lt.s32.totalorder %v1534_v1, %v476_v37  ;;  %v548_v61 = vsel %vm516_vm11, %v269_v46, 0.0  ;;  %v595_v63 = vadd.f32 %v594_v42, %v593_v18  ;;  %p1288_p11 = scmp.ne.s32.totalorder %s1690_s14, %s1287_s8  ;;  %p1295_p13 = scmp.lt.s32.totalorder %s1293_s21, %s1287_s8 }
  0xf9   : > { %v1649_v62 = vpop.eup %1231  ;;  %v656_v0 = vadd.f32 %v655_v43, %v654_v20  ;;  %v600_v2 = vadd.f32 %v599_v44, %v598_v21  ;;  %v663_v3 = vadd.f32 %v662_v54, %v661_v45  ;;  %v605_v7 = vadd.f32 %v604_v58, %v603_v48 }
  0xfa   : > { %v667_v6 = vrot.slane %v666_v59, 4  ;;  %v549_v8 = vsel %vm517_vm12, %v270_v55, 0.0  ;;  %vm534_vm13 = vcmp.lt.s32.totalorder %v1526_v4, %v503_v57  ;;  %v741_v10 = vmul.f32 %v1615_v60, %v637_v9  ;;  %p1289_p12 = pnand %p1288_p11, %p1758_p7  ;;  %p1296_p0 = por %p1295_p13, %p1294_p2 }
  0xfb   : > { %v650_v11 = vrot.slane %v649_v52, 1  ;;  %v588_v12 = vadd.f32 %v587_v53, %v586_v32  ;;  %v610_v15 = vadd.f32 %v549_v8, %v548_v61  ;;  %v606_v22 = vrot.slane %v605_v7, 2 }
  0xfc   : > { %v668_v23 = vadd.f32 %v667_v6, %v666_v59  ;;  %vm535_vm14 = vcmp.lt.s32.totalorder %v1534_v1, %v503_v57  ;;  %v566_v18 = vsel %vm534_vm13, %v287_v5, 0.0  ;;  %v657_v20 = vrot.slane %v656_v0, 1  ;;  %p1290_p10 = pneg %p1289_p12 }
  0xfd   : > { %v601_v21 = vrot.slane %v600_v2, 1  ;;  %v664_v24 = vrot.slane %v663_v3, 1  ;;  %v611_v28 = vrot.slane %v610_v15, 4  ;;  %v607_v33 = vadd.f32 %v606_v22, %v605_v7 }
  0xfe   : > { %v669_v34 = vrot.slane %v668_v23, 2  ;;  %v567_v35 = vsel %vm535_vm14, %v288_v16, 0.0  ;;  %vm518_vm15 = vcmp.lt.s32.totalorder %v1526_v4, %v479_v17  ;;  %v763_v60 = vpack.c.bf16 %v741_v10, %v741_v10  ;;  %p1297_p5 = pnand %p1296_p0, %p1290_p10 }
  0xff   : > { %v651_v32 = vadd.f32 %v650_v11, %v649_v52  ;;  %v612_v36 = vadd.f32 %v611_v28, %v610_v15  ;;  %v673_v37 = vadd.f32 %v567_v35, %v566_v18  ;;  %v608_v42 = vrot.slane %v607_v33, 1 }
 0x100   : > { %v670_v43 = vadd.f32 %v669_v34, %v668_v23  ;;  %vm519_vm0 = vcmp.lt.s32.totalorder %v1534_v1, %v479_v17  ;;  %v550_v44 = vsel %vm518_vm15, %v271_v31, 0.0  ;;  %v727_v45 = vmul.f32 %v1595_v26, %v588_v12 }
 0x101   : > { %v658_v46 = vadd.f32 %v657_v20, %v656_v0  ;;  %v613_v48 = vrot.slane %v612_v36, 2  ;;  %v674_v49 = vrot.slane %v673_v37, 4  ;;  %v602_v50 = vadd.f32 %v601_v21, %v600_v2 }
 0x102   : > { %v665_v9 = vadd.f32 %v664_v24, %v663_v3  ;;  %v671_v53 = vrot.slane %v670_v43, 1  ;;  %v551_v54 = vsel %vm519_vm0, %v272_v40, 0.0  ;;  %v609_v4 = vadd.f32 %v608_v42, %v607_v33 }
 0x103   : > { %v614_v55 = vadd.f32 %v613_v48, %v612_v36  ;;  %v675_v52 = vadd.f32 %v674_v49, %v673_v37  ;;  %v617_v57 = vadd.f32 %v551_v54, %v550_v44  ;;  %v755_v58 = vpack.c.bf16 %v1637_v39, %v1637_v39 }
 0x104   : > { %v729_v59 = vmul.f32 %v1599_v29, %v595_v63  ;;  %v818_v1 = vunpack.c.l.b16 %v763_v60  ;;  %v672_v61 = vadd.f32 %v671_v53, %v670_v43  ;;  %vm826_vm1 = vcmask 1041409  }
 0x105   : > { %v745_v26 = vmul.f32 %v1620_v13, %v651_v32  ;;  %v615_v0 = vrot.slane %v614_v55, 1  ;;  %v676_v5 = vrot.slane %v675_v52, 2  ;;  %v618_v2 = vrot.slane %v617_v57, 4 }
 0x106   : > { %v756_v3 = vpack.c.bf16 %v727_v45, %v727_v45  ;;  %v747_v7 = vmul.f32 %v1632_v30, %v658_v46  ;;  %v731_v6 = vmul.f32 %v1601_v38, %v602_v50  ;;  %v749_v8 = vmul.f32 %v1641_v41, %v665_v9 }
 0x107   : > { %v733_v10 = vmul.f32 %v1608_v47, %v609_v4  ;;  %v616_v39 = vadd.f32 %v615_v0, %v614_v55  ;;  %v677_v11 = vadd.f32 %v676_v5, %v675_v52  ;;  %v619_v29 = vadd.f32 %v618_v2, %v617_v57 }
 0x108   : > { %vm829_vm2 = vcmask 1042434   ;;  %v764_v63 = vpack.c.bf16 %v1629_v27, %v1629_v27  ;;  %v810_v13 = vunpack.c.l.b16 %v755_v58  ;;  %v757_v12 = vpack.c.bf16 %v729_v59, %v729_v59 }
 0x109   : > { %v751_v15 = vmul.f32 %v1645_v19, %v672_v61  ;;  %v765_v16 = vpack.c.bf16 %v745_v26, %v745_v26  ;;  %v735_v30 = vmul.f32 %v1610_v51, %v616_v39  ;;  %v678_v17 = vrot.slane %v677_v11, 1 }
 0x10a   : > { %v620_v38 = vrot.slane %v619_v29, 2  ;;  %v846_v22 = vrot.slane %v818_v1, 7  ;;  %v811_v41 = vunpack.c.l.b16 %v756_v3  ;;  %v766_v23 = vpack.c.bf16 %v747_v7, %v747_v7 }
 0x10b   : > { %v758_v47 = vpack.c.bf16 %v731_v6, %v731_v6  ;;  %vm832_vm3 = vcmask 1043459   ;;  %v767_v18 = vpack.c.bf16 %v749_v8, %v749_v8  ;;  %v759_v20 = vpack.c.bf16 %v733_v10, %v733_v10 }
 0x10c   : > { %v679_v21 = vadd.f32 %v678_v17, %v677_v11  ;;  %v621_v24 = vadd.f32 %v620_v38, %v619_v29  ;;  %v819_v28 = vunpack.c.l.b16 %v764_v63  ;;  %v825_v27 = vrot.slane %v810_v13, 7  ;;  %v1076_v29 = vld [vmem:[%s1741_s3] ss:$0 sm:$0xff] }
 0x10d   : > { %v768_v31 = vpack.c.bf16 %v751_v15, %v751_v15  ;;  %v760_v33 = vpack.c.bf16 %v735_v30, %v735_v30  ;;  %v812_v34 = vunpack.c.l.b16 %v757_v12  ;;  %v820_v19 = vunpack.c.l.b16 %v765_v16 }
 0x10e   : > { %v753_v35 = vmul.f32 %v1649_v62, %v679_v21  ;;  %v622_v51 = vrot.slane %v621_v24, 1  ;;  %v847_v60 = vsel %vm826_vm1, %v846_v22, %v1627_v25  ;;  %v828_v32 = vrot.slane %v811_v41, 6 }
 0x10f   : > { %v821_v36 = vunpack.c.l.b16 %v766_v23  ;;  %v813_v37 = vunpack.c.l.b16 %v758_v47  ;;  %v822_v40 = vunpack.c.l.b16 %v767_v18  ;;  %v814_v42 = vunpack.c.l.b16 %v759_v20 }
 0x110   : > { %v623_v43 = vadd.f32 %v622_v51, %v621_v24  ;;  %v769_v44 = vpack.c.bf16 %v753_v35, %v753_v35  ;;  %v848_v45 = vrot.slane %v819_v28, 6  ;;  %v815_v46 = vunpack.c.l.b16 %v760_v33 }
 0x111   : > { %v823_v48 = vunpack.c.l.b16 %v768_v31  ;;  %vm835_vm4 = vcmask 1044484   ;;  %v827_v49 = vsel %vm826_vm1, %v825_v27, %v1622_v14  ;;  %v850_v50 = vrot.slane %v820_v19, 5 }
 0x112   : > { %v737_v62 = vmul.f32 %v1612_v56, %v623_v43  ;;  %v824_v9 = vunpack.c.l.b16 %v769_v44  ;;  %v852_v53 = vrot.slane %v821_v36, 4  ;;  %v834_v25 = vrot.slane %v813_v37, 4 }
 0x113   : > { %v830_v54 = vsel %vm829_vm2, %v828_v32, %v827_v49  ;;  %v849_v4 = vsel %vm829_vm2, %v848_v45, %v847_v60  ;;  %v831_v55 = vrot.slane %v812_v34, 5  ;;  %v854_v52 = vrot.slane %v822_v40, 3 }
 0x114   : > { %v837_v57 = vrot.slane %v814_v42, 3  ;;  %v761_v58 = vpack.c.bf16 %v737_v62, %v737_v62  ;;  %vm838_vm5 = vcmask 1045509   ;;  %v840_v59 = vrot.slane %v815_v46, 2 }
 0x115   : > { %vm841_vm6 = vcmask 1046534   ;;  %v856_v1 = vrot.slane %v823_v48, 2  ;;  %v833_v14 = vsel %vm832_vm3, %v831_v55, %v830_v54  ;;  %v851_v56 = vsel %vm832_vm3, %v850_v50, %v849_v4 }
 0x116   : > { %v816_v61 = vunpack.c.l.b16 %v761_v58  ;;  %v858_v26 = vrot.slane %v824_v9, 1  ;;  %v836_v0 = vsel %vm835_vm4, %v834_v25, %v833_v14  ;;  %vm844_vm7 = vcmask 1047559  }
 0x117   : > { %v853_v5 = vsel %vm835_vm4, %v852_v53, %v851_v56  ;;  %v839_v2 = vsel %vm838_vm5, %v837_v57, %v836_v0 }
 0x118   : > { %v843_v3 = vrot.slane %v816_v61, 1  ;;  %v855_v7 = vsel %vm838_vm5, %v854_v52, %v853_v5  ;;  %v842_v6 = vsel %vm841_vm6, %v840_v59, %v839_v2 }
 0x119   : > { %v857_v8 = vsel %vm841_vm6, %v856_v1, %v855_v7 }
 0x11a   : > { %v845_v10 = vsel %vm844_vm7, %v843_v3, %v842_v6  ;;  %v859_v39 = vsel %vm844_vm7, %v858_v26, %v857_v8 }
 0x11b   : > { %v860_v11 = vpack.c.b16 %v859_v39, %v845_v10 }
 0x11d   : > { %1119 = vmatmul.mubr.bf16.vlgmr.msra.gmra.mxu0 %v860_v11 }
 0x1dd   : > { %v944_v63 = vpop.f32.mrf.mxu0 }
 0x1de   : > { %v945_v13 = vadd.f32 %v1076_v29, %v944_v63 }
 0x1df   : > { %v1120_v12 = vpop.f32.mrf.mxu0 }
 0x1e0   : > { %951 = vst [vmem:[%s247_s13] sm:$0xff] %v945_v13 }
 0x1e1   : > { %v947_v15 = vpop.f32.mrf.mxu0 }
 0x1e2   : > { %v948_v16 = vadd.f32 %v1076_v29, %v947_v15 }
 0x1e3   : > { %v1121_v30 = vpop.f32.mrf.mxu0 }
 0x1e4   : > { %952 = vst [vmem:[%s247_s13 + $0x8] sm:$0xff] %v948_v16 }
 0x1e5   : > { %1300 = shalt.err (!%p1297_p5)
}
 0x1e6   : > { %s1301_s24 = scalar_lea.hbm %s1695_s6, 256  ;;  %s1305_s29 = scalar_lea.hbm %s1742_s4, 512 }
 0x1e7   : > { %p1302_p9 = scmp.ne.s32.totalorder %s1695_s6, %s1301_s24  ;;  %p1306_p6 = scmp.lt.s32.totalorder %s1695_s6, %s1742_s4 }
 0x1e8   : > { %p1307_p8 = scmp.lt.s32.totalorder %s1305_s29, %s1301_s24 }
 0x1e9   : > { %p1303_p1 = pnand %p1302_p9, %p1758_p7 }
 0x1ea   : > { %p1308_p3 = por %p1307_p8, %p1306_p6 }
 0x1eb   : > { %p1304_p4 = pneg %p1303_p1 }
 0x1ed   : > { %p1309_p11 = pnand %p1308_p3, %p1304_p4 }
 0x1ef   : > { %1312 = shalt.err (!%p1309_p11)
}
 0x1f0   : > { %s1368_s13 = smov 128   ;;  %s1369_s20 = smov 8  }
 0x1f1   : > { %1128 = dma.vmem_to_hbm [thread:$0]  (%p1758_p7), %s1690_s14, 256, %s1695_s6, %s954_s7, %s1368_s13, %s1368_s13, %s1369_s20  }
 0x1f2 PF: > { %s982_s25 = sand.u32 1, %s1343_s15   ;;  %p1759_p12 = scmp.ne.s32.totalorder %s1748_s22, 0 }
 0x1f3   : > { %p1760_p10 = scmp.ge.s32.totalorder %s1355_s18, 2  ;;  %s983_s30 = scalar_lea.sflag [#allocation4], %s982_s25 }
 0x1f5   : > { %p1139_p2 = pnand %p1760_p10, %p1759_p12 }
 0x1f7   : > { %p1140_p13 = pneg %p1139_p2 }
 0x1f9   : > { %1338 = dma.done.wait (%p1140_p13), %s983_s30, 256  }
 0x1fa   : > { %1340 = vsyncadd (%p1140_p13), %s983_s30, 4294967040  ;;  %p18_p0 = scmp.ge.s32.totalorder %s1449_s27, 4   ;;  %s1761_s15 = smov %s1347_s16 }
 0x1fb   : > { %s1762_s16 = smov %s1351_s17  ;;  %s1763_s17 = smov %s1466_s9 }
 0x1fc   : > { %s1764_s18 = smov %s1449_s27  ;;  %20 = sbr.rel (!%p18_p0) target bundleno = 6 (0x6), region = 88 }
 0x201   :  { %988 = vsyncpa [#allocation3], 1 }
 0x202   :  { %990 = vsyncpa [#allocation3 + $0x1], 1 }
 0x203   :  { %991 = vsyncpa [#allocation6], 1 }
 0x204   :  { %992 = vsyncpa [#allocation4], 1 }
 0x205   :  { %994 = vsyncpa [#allocation4 + $0x1], 1 }

</bundles_post_ra>
